<compile_context>
chip_gen: v7x
topology: tpu7x:2x2x1
jax: 0.10.0
libtpu: 0.0.40
codegen_flags: <defaults>
</compile_context>

<pallas_src>
import jax
import jax.numpy as jnp
from jax import lax
from jax.experimental import pallas as pl
from jax.experimental.pallas import tpu as pltpu


def _round_up(n, m):
    return ((n + m - 1) // m) * m


def make_lstm_fc_kernel(T, Bp, H):
    """Build the kernel as a closure over the static sizes (T, padded batch, hidden)."""

    def kernel(x_ref, wih_ref, whh_ref, b_ref, wfc_ref, bfc_ref, out_ref, xproj_ref):
        # ---- Phase 1: hoisted input projection (no sequential dependence) ----------
        # x_ref: (T*Bp, D) laid out so rows [t*Bp, (t+1)*Bp) are timestep t.
        xproj_ref[...] = (
            jnp.dot(x_ref[...], wih_ref[...], preferred_element_type=jnp.float32)
            + b_ref[...]
        )  # (T*Bp, 4H)

        whh = whh_ref[...]  # (H, 4H) resident in vregs/VMEM across the loop

        # ---- Phase 2: serial recurrence over time (only h @ W_hh^T per step) -------
        def step(t, carry):
            h, c = carry
            off = pl.multiple_of(t * Bp, Bp)  # sublane-aligned slab start
            gates = xproj_ref[pl.ds(off, Bp), :] + jnp.dot(
                h, whh, preferred_element_type=jnp.float32
            )  # (Bp, 4H)
            i = jax.nn.sigmoid(gates[:, 0 * H:1 * H])
            f = jax.nn.sigmoid(gates[:, 1 * H:2 * H])
            g = jnp.tanh(gates[:, 2 * H:3 * H])
            o = jax.nn.sigmoid(gates[:, 3 * H:4 * H])
            c_new = f * c + i * g
            h_new = o * jnp.tanh(c_new)  # tanh(c_new) computed exactly once
            return (h_new, c_new)

        h0 = jnp.zeros((Bp, H), jnp.float32)
        c0 = jnp.zeros((Bp, H), jnp.float32)
        h, _ = lax.fori_loop(0, T, step, (h0, c0), unroll=True)

        # ---- Phase 3: final fully-connected layer on the last hidden state ---------
        out_ref[...] = (
            jnp.dot(h, wfc_ref[...], preferred_element_type=jnp.float32) + bfc_ref[...]
        )  # (Bp, Op) lane-dense store

    return kernel


def time_series_model_forward(x, params):
    """x: (B, T, D) float32. Returns (B, output_size) float32."""
    B, T, D = x.shape
    H = params["w_hh"].shape[1]
    O = params["w_fc"].shape[0]

    Bp = _round_up(B, 8)      # f32 sublane height
    Op = _round_up(O, 128)    # lane-dense output tile

    # Layout plumbing (pure data movement, no compute hoisted out of the kernel):
    # (B,T,D) -> (T,Bp,D) -> (T*Bp, D): timestep t is rows [t*Bp, (t+1)*Bp).
    x_tbd = jnp.transpose(x, (1, 0, 2))
    x_tbd = jnp.pad(x_tbd, ((0, 0), (0, Bp - B), (0, 0)))
    x_seq = x_tbd.reshape(T * Bp, D)

    w_ih_t = jnp.asarray(params["w_ih"]).T                              # (D, 4H)
    w_hh_t = jnp.asarray(params["w_hh"]).T                              # (H, 4H)
    b = (params["b_ih"] + params["b_hh"])[None, :]                      # (1, 4H)
    w_fc_t = jnp.pad(jnp.asarray(params["w_fc"]).T, ((0, 0), (0, Op - O)))  # (H, Op)
    b_fc = jnp.pad(jnp.asarray(params["b_fc"]), (0, Op - O))[None, :]       # (1, Op)

    kernel = make_lstm_fc_kernel(T, Bp, H)

    out_padded = pl.pallas_call(
        kernel,
        out_shape=jax.ShapeDtypeStruct((Bp, Op), jnp.float32),
        # No grid: everything (x_seq + weights) is VMEM-resident for one invocation;
        # the recurrence is an in-kernel loop, so there is no per-step grid overhead.
        scratch_shapes=[
            pltpu.VMEM((T * Bp, 4 * H), jnp.float32),  # hoisted x-projection
        ],
    )(x_seq, w_ih_t, w_hh_t, b, w_fc_t, b_fc)

    return out_padded[:B, :O]


def reference_forward(x, params):
    """Pure-JAX reference with identical PyTorch LSTM semantics."""
    B, T, D = x.shape
    H = params["w_hh"].shape[1]
    w_ih_t = params["w_ih"].T
    w_hh_t = params["w_hh"].T
    b = params["b_ih"] + params["b_hh"]

    def step(carry, x_t):
        h, c = carry
        gates = x_t @ w_ih_t + h @ w_hh_t + b
        i = jax.nn.sigmoid(gates[:, 0 * H:1 * H])
        f = jax.nn.sigmoid(gates[:, 1 * H:2 * H])
        g = jnp.tanh(gates[:, 2 * H:3 * H])
        o = jax.nn.sigmoid(gates[:, 3 * H:4 * H])
        c = f * c + i * g
        h = o * jnp.tanh(c)
        return (h, c), None

    h0 = jnp.zeros((B, H), jnp.float32)
    c0 = jnp.zeros((B, H), jnp.float32)
    (h, _), _ = lax.scan(step, (h0, c0), jnp.transpose(x, (1, 0, 2)))
    return h @ params["w_fc"].T + params["b_fc"]


def init_params(key, input_size, hidden_size, output_size):
    ks = jax.random.split(key, 6)
    scale = 0.1
    return {
        "w_ih": scale * jax.random.normal(ks[0], (4 * hidden_size, input_size), jnp.float32),
        "w_hh": scale * jax.random.normal(ks[1], (4 * hidden_size, hidden_size), jnp.float32),
        "b_ih": scale * jax.random.normal(ks[2], (4 * hidden_size,), jnp.float32),
        "b_hh": scale * jax.random.normal(ks[3], (4 * hidden_size,), jnp.float32),
        "w_fc": scale * jax.random.normal(ks[4], (output_size, hidden_size), jnp.float32),
        "b_fc": scale * jax.random.normal(ks[5], (output_size,), jnp.float32),
    }


if __name__ == "__main__":
    B, T, D, H, O = 2, 8, 4, 32, 4
    key = jax.random.PRNGKey(0)
    kx, kp = jax.random.split(key)
    x = jax.random.normal(kx, (B, T, D), jnp.float32)
    params = init_params(kp, D, H, O)

    out = jax.block_until_ready(time_series_model_forward(x, params))
    ref = jax.block_until_ready(reference_forward(x, params))

    assert out.shape == (B, O), out.shape
    assert jnp.allclose(out, ref, atol=1e-5, rtol=1e-5), (out, ref)
    print("KERNEL_OK")
</pallas_src>

<mosaic_0001>
module attributes {stable_mosaic.version = 11 : i64} {
  func.func @kernel(%arg0: memref<64x4xf32, #tpu.memory_space<vmem>>, %arg1: memref<4x128xf32, #tpu.memory_space<vmem>>, %arg2: memref<32x128xf32, #tpu.memory_space<vmem>>, %arg3: memref<1x128xf32, #tpu.memory_space<vmem>>, %arg4: memref<32x128xf32, #tpu.memory_space<vmem>>, %arg5: memref<1x128xf32, #tpu.memory_space<vmem>>, %arg6: memref<8x128xf32, #tpu.memory_space<vmem>>, %arg7: memref<64x128xf32, #tpu.memory_space<vmem>>) attributes {dimension_semantics = [], scalar_prefetch = 0 : i64, scratch_operands = 1 : i64, tpu.core_type = #tpu.core_type<tc>} {
    %c0 = arith.constant 0 : index
    %c0_0 = arith.constant 0 : index
    %0 = vector.load %arg0[%c0, %c0_0] : memref<64x4xf32, #tpu.memory_space<vmem>>, vector<64x4xf32>
    %c0_1 = arith.constant 0 : index
    %c0_2 = arith.constant 0 : index
    %1 = vector.load %arg1[%c0_1, %c0_2] : memref<4x128xf32, #tpu.memory_space<vmem>>, vector<4x128xf32>
    %cst = arith.constant dense<0.000000e+00> : vector<64x128xf32>
    %2 = tpu.matmul %0, %1, %cst {dimension_numbers = #tpu.dot_dimension_numbers<[1], [0], [0], [1], [0, 0, 1, 1], [], []>} : vector<64x4xf32>, vector<4x128xf32>, vector<64x128xf32> -> vector<64x128xf32>
    %c0_3 = arith.constant 0 : index
    %c0_4 = arith.constant 0 : index
    %3 = vector.load %arg3[%c0_3, %c0_4] : memref<1x128xf32, #tpu.memory_space<vmem>>, vector<1x128xf32>
    %4 = vector.broadcast %3 : vector<1x128xf32> to vector<64x128xf32>
    %5 = arith.addf %2, %4 : vector<64x128xf32>
    %c0_5 = arith.constant 0 : index
    %c0_6 = arith.constant 0 : index
    %6 = vector.load %arg7[%c0_5, %c0_6] : memref<64x128xf32, #tpu.memory_space<vmem>>, vector<64x128xf32>
    tpu.vector_store %arg7[%c0_5, %c0_6], %5 {strides = array<i32>} : memref<64x128xf32, #tpu.memory_space<vmem>>, vector<64x128xf32>,
    %c0_7 = arith.constant 0 : index
    %c0_8 = arith.constant 0 : index
    %7 = vector.load %arg2[%c0_7, %c0_8] : memref<32x128xf32, #tpu.memory_space<vmem>>, vector<32x128xf32>
    %cst_9 = arith.constant 0.000000e+00 : f32
    %8 = vector.broadcast %cst_9 : f32 to vector<8x32xf32>
    %cst_10 = arith.constant 0.000000e+00 : f32
    %9 = vector.broadcast %cst_10 : f32 to vector<8x32xf32>
    %c0_i32 = arith.constant 0 : i32
    %c8_i32 = arith.constant 8 : i32
    %10 = arith.muli %c0_i32, %c8_i32 : i32
    %11 = tpu.assume_multiple %10, 8 : i32
    %12 = arith.index_cast %11 : i32 to index
    %c0_11 = arith.constant 0 : index
    %13 = vector.load %arg7[%12, %c0_11] : memref<64x128xf32, #tpu.memory_space<vmem>>, vector<8x128xf32>
    %cst_12 = arith.constant dense<0.000000e+00> : vector<8x128xf32>
    %14 = tpu.matmul %8, %7, %cst_12 {dimension_numbers = #tpu.dot_dimension_numbers<[1], [0], [0], [1], [0, 0, 1, 1], [], []>} : vector<8x32xf32>, vector<32x128xf32>, vector<8x128xf32> -> vector<8x128xf32>
    %15 = arith.addf %13, %14 : vector<8x128xf32>
    %16 = vector.extract_strided_slice %15 {offsets = [0, 0], sizes = [8, 32], strides = [1, 1]} : vector<8x128xf32> to vector<8x32xf32>
    %17 = arith.negf %16 : vector<8x32xf32>
    %18 = math.exp %17 : vector<8x32xf32>
    %cst_13 = arith.constant 1.000000e+00 : f32
    %19 = vector.broadcast %cst_13 : f32 to vector<8x32xf32>
    %20 = arith.addf %19, %18 : vector<8x32xf32>
    %21 = arith.divf %19, %20 : vector<8x32xf32>
    %22 = vector.extract_strided_slice %15 {offsets = [0, 32], sizes = [8, 32], strides = [1, 1]} : vector<8x128xf32> to vector<8x32xf32>
    %23 = arith.negf %22 : vector<8x32xf32>
    %24 = math.exp %23 : vector<8x32xf32>
    %cst_14 = arith.constant 1.000000e+00 : f32
    %25 = vector.broadcast %cst_14 : f32 to vector<8x32xf32>
    %26 = arith.addf %25, %24 : vector<8x32xf32>
    %27 = arith.divf %25, %26 : vector<8x32xf32>
    %28 = vector.extract_strided_slice %15 {offsets = [0, 64], sizes = [8, 32], strides = [1, 1]} : vector<8x128xf32> to vector<8x32xf32>
    %29 = math.tanh %28 : vector<8x32xf32>
    %30 = vector.extract_strided_slice %15 {offsets = [0, 96], sizes = [8, 32], strides = [1, 1]} : vector<8x128xf32> to vector<8x32xf32>
    %31 = arith.negf %30 : vector<8x32xf32>
    %32 = math.exp %31 : vector<8x32xf32>
    %cst_15 = arith.constant 1.000000e+00 : f32
    %33 = vector.broadcast %cst_15 : f32 to vector<8x32xf32>
    %34 = arith.addf %33, %32 : vector<8x32xf32>
    %35 = arith.divf %33, %34 : vector<8x32xf32>
    %36 = arith.mulf %27, %9 : vector<8x32xf32>
    %37 = arith.mulf %21, %29 : vector<8x32xf32>
    %38 = arith.addf %36, %37 : vector<8x32xf32>
    %39 = math.tanh %38 : vector<8x32xf32>
    %40 = arith.mulf %35, %39 : vector<8x32xf32>
    %c1_i32 = arith.constant 1 : i32
    %c8_i32_16 = arith.constant 8 : i32
    %41 = arith.muli %c1_i32, %c8_i32_16 : i32
    %42 = tpu.assume_multiple %41, 8 : i32
    %43 = arith.index_cast %42 : i32 to index
    %c0_17 = arith.constant 0 : index
    %44 = vector.load %arg7[%43, %c0_17] : memref<64x128xf32, #tpu.memory_space<vmem>>, vector<8x128xf32>
    %cst_18 = arith.constant dense<0.000000e+00> : vector<8x128xf32>
    %45 = tpu.matmul %40, %7, %cst_18 {dimension_numbers = #tpu.dot_dimension_numbers<[1], [0], [0], [1], [0, 0, 1, 1], [], []>} : vector<8x32xf32>, vector<32x128xf32>, vector<8x128xf32> -> vector<8x128xf32>
    %46 = arith.addf %44, %45 : vector<8x128xf32>
    %47 = vector.extract_strided_slice %46 {offsets = [0, 0], sizes = [8, 32], strides = [1, 1]} : vector<8x128xf32> to vector<8x32xf32>
    %48 = arith.negf %47 : vector<8x32xf32>
    %49 = math.exp %48 : vector<8x32xf32>
    %cst_19 = arith.constant 1.000000e+00 : f32
    %50 = vector.broadcast %cst_19 : f32 to vector<8x32xf32>
    %51 = arith.addf %50, %49 : vector<8x32xf32>
    %52 = arith.divf %50, %51 : vector<8x32xf32>
    %53 = vector.extract_strided_slice %46 {offsets = [0, 32], sizes = [8, 32], strides = [1, 1]} : vector<8x128xf32> to vector<8x32xf32>
    %54 = arith.negf %53 : vector<8x32xf32>
    %55 = math.exp %54 : vector<8x32xf32>
    %cst_20 = arith.constant 1.000000e+00 : f32
    %56 = vector.broadcast %cst_20 : f32 to vector<8x32xf32>
    %57 = arith.addf %56, %55 : vector<8x32xf32>
    %58 = arith.divf %56, %57 : vector<8x32xf32>
    %59 = vector.extract_strided_slice %46 {offsets = [0, 64], sizes = [8, 32], strides = [1, 1]} : vector<8x128xf32> to vector<8x32xf32>
    %60 = math.tanh %59 : vector<8x32xf32>
    %61 = vector.extract_strided_slice %46 {offsets = [0, 96], sizes = [8, 32], strides = [1, 1]} : vector<8x128xf32> to vector<8x32xf32>
    %62 = arith.negf %61 : vector<8x32xf32>
    %63 = math.exp %62 : vector<8x32xf32>
    %cst_21 = arith.constant 1.000000e+00 : f32
    %64 = vector.broadcast %cst_21 : f32 to vector<8x32xf32>
    %65 = arith.addf %64, %63 : vector<8x32xf32>
    %66 = arith.divf %64, %65 : vector<8x32xf32>
    %67 = arith.mulf %58, %38 : vector<8x32xf32>
    %68 = arith.mulf %52, %60 : vector<8x32xf32>
    %69 = arith.addf %67, %68 : vector<8x32xf32>
    %70 = math.tanh %69 : vector<8x32xf32>
    %71 = arith.mulf %66, %70 : vector<8x32xf32>
    %c2_i32 = arith.constant 2 : i32
    %c8_i32_22 = arith.constant 8 : i32
    %72 = arith.muli %c2_i32, %c8_i32_22 : i32
    %73 = tpu.assume_multiple %72, 8 : i32
    %74 = arith.index_cast %73 : i32 to index
    %c0_23 = arith.constant 0 : index
    %75 = vector.load %arg7[%74, %c0_23] : memref<64x128xf32, #tpu.memory_space<vmem>>, vector<8x128xf32>
    %cst_24 = arith.constant dense<0.000000e+00> : vector<8x128xf32>
    %76 = tpu.matmul %71, %7, %cst_24 {dimension_numbers = #tpu.dot_dimension_numbers<[1], [0], [0], [1], [0, 0, 1, 1], [], []>} : vector<8x32xf32>, vector<32x128xf32>, vector<8x128xf32> -> vector<8x128xf32>
    %77 = arith.addf %75, %76 : vector<8x128xf32>
    %78 = vector.extract_strided_slice %77 {offsets = [0, 0], sizes = [8, 32], strides = [1, 1]} : vector<8x128xf32> to vector<8x32xf32>
    %79 = arith.negf %78 : vector<8x32xf32>
    %80 = math.exp %79 : vector<8x32xf32>
    %cst_25 = arith.constant 1.000000e+00 : f32
    %81 = vector.broadcast %cst_25 : f32 to vector<8x32xf32>
    %82 = arith.addf %81, %80 : vector<8x32xf32>
    %83 = arith.divf %81, %82 : vector<8x32xf32>
    %84 = vector.extract_strided_slice %77 {offsets = [0, 32], sizes = [8, 32], strides = [1, 1]} : vector<8x128xf32> to vector<8x32xf32>
    %85 = arith.negf %84 : vector<8x32xf32>
    %86 = math.exp %85 : vector<8x32xf32>
    %cst_26 = arith.constant 1.000000e+00 : f32
    %87 = vector.broadcast %cst_26 : f32 to vector<8x32xf32>
    %88 = arith.addf %87, %86 : vector<8x32xf32>
    %89 = arith.divf %87, %88 : vector<8x32xf32>
    %90 = vector.extract_strided_slice %77 {offsets = [0, 64], sizes = [8, 32], strides = [1, 1]} : vector<8x128xf32> to vector<8x32xf32>
    %91 = math.tanh %90 : vector<8x32xf32>
    %92 = vector.extract_strided_slice %77 {offsets = [0, 96], sizes = [8, 32], strides = [1, 1]} : vector<8x128xf32> to vector<8x32xf32>
    %93 = arith.negf %92 : vector<8x32xf32>
    %94 = math.exp %93 : vector<8x32xf32>
    %cst_27 = arith.constant 1.000000e+00 : f32
    %95 = vector.broadcast %cst_27 : f32 to vector<8x32xf32>
    %96 = arith.addf %95, %94 : vector<8x32xf32>
    %97 = arith.divf %95, %96 : vector<8x32xf32>
    %98 = arith.mulf %89, %69 : vector<8x32xf32>
    %99 = arith.mulf %83, %91 : vector<8x32xf32>
    %100 = arith.addf %98, %99 : vector<8x32xf32>
    %101 = math.tanh %100 : vector<8x32xf32>
    %102 = arith.mulf %97, %101 : vector<8x32xf32>
    %c3_i32 = arith.constant 3 : i32
    %c8_i32_28 = arith.constant 8 : i32
    %103 = arith.muli %c3_i32, %c8_i32_28 : i32
    %104 = tpu.assume_multiple %103, 8 : i32
    %105 = arith.index_cast %104 : i32 to index
    %c0_29 = arith.constant 0 : index
    %106 = vector.load %arg7[%105, %c0_29] : memref<64x128xf32, #tpu.memory_space<vmem>>, vector<8x128xf32>
    %cst_30 = arith.constant dense<0.000000e+00> : vector<8x128xf32>
    %107 = tpu.matmul %102, %7, %cst_30 {dimension_numbers = #tpu.dot_dimension_numbers<[1], [0], [0], [1], [0, 0, 1, 1], [], []>} : vector<8x32xf32>, vector<32x128xf32>, vector<8x128xf32> -> vector<8x128xf32>
    %108 = arith.addf %106, %107 : vector<8x128xf32>
    %109 = vector.extract_strided_slice %108 {offsets = [0, 0], sizes = [8, 32], strides = [1, 1]} : vector<8x128xf32> to vector<8x32xf32>
    %110 = arith.negf %109 : vector<8x32xf32>
    %111 = math.exp %110 : vector<8x32xf32>
    %cst_31 = arith.constant 1.000000e+00 : f32
    %112 = vector.broadcast %cst_31 : f32 to vector<8x32xf32>
    %113 = arith.addf %112, %111 : vector<8x32xf32>
    %114 = arith.divf %112, %113 : vector<8x32xf32>
    %115 = vector.extract_strided_slice %108 {offsets = [0, 32], sizes = [8, 32], strides = [1, 1]} : vector<8x128xf32> to vector<8x32xf32>
    %116 = arith.negf %115 : vector<8x32xf32>
    %117 = math.exp %116 : vector<8x32xf32>
    %cst_32 = arith.constant 1.000000e+00 : f32
    %118 = vector.broadcast %cst_32 : f32 to vector<8x32xf32>
    %119 = arith.addf %118, %117 : vector<8x32xf32>
    %120 = arith.divf %118, %119 : vector<8x32xf32>
    %121 = vector.extract_strided_slice %108 {offsets = [0, 64], sizes = [8, 32], strides = [1, 1]} : vector<8x128xf32> to vector<8x32xf32>
    %122 = math.tanh %121 : vector<8x32xf32>
    %123 = vector.extract_strided_slice %108 {offsets = [0, 96], sizes = [8, 32], strides = [1, 1]} : vector<8x128xf32> to vector<8x32xf32>
    %124 = arith.negf %123 : vector<8x32xf32>
    %125 = math.exp %124 : vector<8x32xf32>
    %cst_33 = arith.constant 1.000000e+00 : f32
    %126 = vector.broadcast %cst_33 : f32 to vector<8x32xf32>
    %127 = arith.addf %126, %125 : vector<8x32xf32>
    %128 = arith.divf %126, %127 : vector<8x32xf32>
    %129 = arith.mulf %120, %100 : vector<8x32xf32>
    %130 = arith.mulf %114, %122 : vector<8x32xf32>
    %131 = arith.addf %129, %130 : vector<8x32xf32>
    %132 = math.tanh %131 : vector<8x32xf32>
    %133 = arith.mulf %128, %132 : vector<8x32xf32>
    %c4_i32 = arith.constant 4 : i32
    %c8_i32_34 = arith.constant 8 : i32
    %134 = arith.muli %c4_i32, %c8_i32_34 : i32
    %135 = tpu.assume_multiple %134, 8 : i32
    %136 = arith.index_cast %135 : i32 to index
    %c0_35 = arith.constant 0 : index
    %137 = vector.load %arg7[%136, %c0_35] : memref<64x128xf32, #tpu.memory_space<vmem>>, vector<8x128xf32>
    %cst_36 = arith.constant dense<0.000000e+00> : vector<8x128xf32>
    %138 = tpu.matmul %133, %7, %cst_36 {dimension_numbers = #tpu.dot_dimension_numbers<[1], [0], [0], [1], [0, 0, 1, 1], [], []>} : vector<8x32xf32>, vector<32x128xf32>, vector<8x128xf32> -> vector<8x128xf32>
    %139 = arith.addf %137, %138 : vector<8x128xf32>
    %140 = vector.extract_strided_slice %139 {offsets = [0, 0], sizes = [8, 32], strides = [1, 1]} : vector<8x128xf32> to vector<8x32xf32>
    %141 = arith.negf %140 : vector<8x32xf32>
    %142 = math.exp %141 : vector<8x32xf32>
    %cst_37 = arith.constant 1.000000e+00 : f32
    %143 = vector.broadcast %cst_37 : f32 to vector<8x32xf32>
    %144 = arith.addf %143, %142 : vector<8x32xf32>
    %145 = arith.divf %143, %144 : vector<8x32xf32>
    %146 = vector.extract_strided_slice %139 {offsets = [0, 32], sizes = [8, 32], strides = [1, 1]} : vector<8x128xf32> to vector<8x32xf32>
    %147 = arith.negf %146 : vector<8x32xf32>
    %148 = math.exp %147 : vector<8x32xf32>
    %cst_38 = arith.constant 1.000000e+00 : f32
    %149 = vector.broadcast %cst_38 : f32 to vector<8x32xf32>
    %150 = arith.addf %149, %148 : vector<8x32xf32>
    %151 = arith.divf %149, %150 : vector<8x32xf32>
    %152 = vector.extract_strided_slice %139 {offsets = [0, 64], sizes = [8, 32], strides = [1, 1]} : vector<8x128xf32> to vector<8x32xf32>
    %153 = math.tanh %152 : vector<8x32xf32>
    %154 = vector.extract_strided_slice %139 {offsets = [0, 96], sizes = [8, 32], strides = [1, 1]} : vector<8x128xf32> to vector<8x32xf32>
    %155 = arith.negf %154 : vector<8x32xf32>
    %156 = math.exp %155 : vector<8x32xf32>
    %cst_39 = arith.constant 1.000000e+00 : f32
    %157 = vector.broadcast %cst_39 : f32 to vector<8x32xf32>
    %158 = arith.addf %157, %156 : vector<8x32xf32>
    %159 = arith.divf %157, %158 : vector<8x32xf32>
    %160 = arith.mulf %151, %131 : vector<8x32xf32>
    %161 = arith.mulf %145, %153 : vector<8x32xf32>
    %162 = arith.addf %160, %161 : vector<8x32xf32>
    %163 = math.tanh %162 : vector<8x32xf32>
    %164 = arith.mulf %159, %163 : vector<8x32xf32>
    %c5_i32 = arith.constant 5 : i32
    %c8_i32_40 = arith.constant 8 : i32
    %165 = arith.muli %c5_i32, %c8_i32_40 : i32
    %166 = tpu.assume_multiple %165, 8 : i32
    %167 = arith.index_cast %166 : i32 to index
    %c0_41 = arith.constant 0 : index
    %168 = vector.load %arg7[%167, %c0_41] : memref<64x128xf32, #tpu.memory_space<vmem>>, vector<8x128xf32>
    %cst_42 = arith.constant dense<0.000000e+00> : vector<8x128xf32>
    %169 = tpu.matmul %164, %7, %cst_42 {dimension_numbers = #tpu.dot_dimension_numbers<[1], [0], [0], [1], [0, 0, 1, 1], [], []>} : vector<8x32xf32>, vector<32x128xf32>, vector<8x128xf32> -> vector<8x128xf32>
    %170 = arith.addf %168, %169 : vector<8x128xf32>
    %171 = vector.extract_strided_slice %170 {offsets = [0, 0], sizes = [8, 32], strides = [1, 1]} : vector<8x128xf32> to vector<8x32xf32>
    %172 = arith.negf %171 : vector<8x32xf32>
    %173 = math.exp %172 : vector<8x32xf32>
    %cst_43 = arith.constant 1.000000e+00 : f32
    %174 = vector.broadcast %cst_43 : f32 to vector<8x32xf32>
    %175 = arith.addf %174, %173 : vector<8x32xf32>
    %176 = arith.divf %174, %175 : vector<8x32xf32>
    %177 = vector.extract_strided_slice %170 {offsets = [0, 32], sizes = [8, 32], strides = [1, 1]} : vector<8x128xf32> to vector<8x32xf32>
    %178 = arith.negf %177 : vector<8x32xf32>
    %179 = math.exp %178 : vector<8x32xf32>
    %cst_44 = arith.constant 1.000000e+00 : f32
    %180 = vector.broadcast %cst_44 : f32 to vector<8x32xf32>
    %181 = arith.addf %180, %179 : vector<8x32xf32>
    %182 = arith.divf %180, %181 : vector<8x32xf32>
    %183 = vector.extract_strided_slice %170 {offsets = [0, 64], sizes = [8, 32], strides = [1, 1]} : vector<8x128xf32> to vector<8x32xf32>
    %184 = math.tanh %183 : vector<8x32xf32>
    %185 = vector.extract_strided_slice %170 {offsets = [0, 96], sizes = [8, 32], strides = [1, 1]} : vector<8x128xf32> to vector<8x32xf32>
    %186 = arith.negf %185 : vector<8x32xf32>
    %187 = math.exp %186 : vector<8x32xf32>
    %cst_45 = arith.constant 1.000000e+00 : f32
    %188 = vector.broadcast %cst_45 : f32 to vector<8x32xf32>
    %189 = arith.addf %188, %187 : vector<8x32xf32>
    %190 = arith.divf %188, %189 : vector<8x32xf32>
    %191 = arith.mulf %182, %162 : vector<8x32xf32>
    %192 = arith.mulf %176, %184 : vector<8x32xf32>
    %193 = arith.addf %191, %192 : vector<8x32xf32>
    %194 = math.tanh %193 : vector<8x32xf32>
    %195 = arith.mulf %190, %194 : vector<8x32xf32>
    %c6_i32 = arith.constant 6 : i32
    %c8_i32_46 = arith.constant 8 : i32
    %196 = arith.muli %c6_i32, %c8_i32_46 : i32
    %197 = tpu.assume_multiple %196, 8 : i32
    %198 = arith.index_cast %197 : i32 to index
    %c0_47 = arith.constant 0 : index
    %199 = vector.load %arg7[%198, %c0_47] : memref<64x128xf32, #tpu.memory_space<vmem>>, vector<8x128xf32>
    %cst_48 = arith.constant dense<0.000000e+00> : vector<8x128xf32>
    %200 = tpu.matmul %195, %7, %cst_48 {dimension_numbers = #tpu.dot_dimension_numbers<[1], [0], [0], [1], [0, 0, 1, 1], [], []>} : vector<8x32xf32>, vector<32x128xf32>, vector<8x128xf32> -> vector<8x128xf32>
    %201 = arith.addf %199, %200 : vector<8x128xf32>
    %202 = vector.extract_strided_slice %201 {offsets = [0, 0], sizes = [8, 32], strides = [1, 1]} : vector<8x128xf32> to vector<8x32xf32>
    %203 = arith.negf %202 : vector<8x32xf32>
    %204 = math.exp %203 : vector<8x32xf32>
    %cst_49 = arith.constant 1.000000e+00 : f32
    %205 = vector.broadcast %cst_49 : f32 to vector<8x32xf32>
    %206 = arith.addf %205, %204 : vector<8x32xf32>
    %207 = arith.divf %205, %206 : vector<8x32xf32>
    %208 = vector.extract_strided_slice %201 {offsets = [0, 32], sizes = [8, 32], strides = [1, 1]} : vector<8x128xf32> to vector<8x32xf32>
    %209 = arith.negf %208 : vector<8x32xf32>
    %210 = math.exp %209 : vector<8x32xf32>
    %cst_50 = arith.constant 1.000000e+00 : f32
    %211 = vector.broadcast %cst_50 : f32 to vector<8x32xf32>
    %212 = arith.addf %211, %210 : vector<8x32xf32>
    %213 = arith.divf %211, %212 : vector<8x32xf32>
    %214 = vector.extract_strided_slice %201 {offsets = [0, 64], sizes = [8, 32], strides = [1, 1]} : vector<8x128xf32> to vector<8x32xf32>
    %215 = math.tanh %214 : vector<8x32xf32>
    %216 = vector.extract_strided_slice %201 {offsets = [0, 96], sizes = [8, 32], strides = [1, 1]} : vector<8x128xf32> to vector<8x32xf32>
    %217 = arith.negf %216 : vector<8x32xf32>
    %218 = math.exp %217 : vector<8x32xf32>
    %cst_51 = arith.constant 1.000000e+00 : f32
    %219 = vector.broadcast %cst_51 : f32 to vector<8x32xf32>
    %220 = arith.addf %219, %218 : vector<8x32xf32>
    %221 = arith.divf %219, %220 : vector<8x32xf32>
    %222 = arith.mulf %213, %193 : vector<8x32xf32>
    %223 = arith.mulf %207, %215 : vector<8x32xf32>
    %224 = arith.addf %222, %223 : vector<8x32xf32>
    %225 = math.tanh %224 : vector<8x32xf32>
    %226 = arith.mulf %221, %225 : vector<8x32xf32>
    %c7_i32 = arith.constant 7 : i32
    %c8_i32_52 = arith.constant 8 : i32
    %227 = arith.muli %c7_i32, %c8_i32_52 : i32
    %228 = tpu.assume_multiple %227, 8 : i32
    %229 = arith.index_cast %228 : i32 to index
    %c0_53 = arith.constant 0 : index
    %230 = vector.load %arg7[%229, %c0_53] : memref<64x128xf32, #tpu.memory_space<vmem>>, vector<8x128xf32>
    %cst_54 = arith.constant dense<0.000000e+00> : vector<8x128xf32>
    %231 = tpu.matmul %226, %7, %cst_54 {dimension_numbers = #tpu.dot_dimension_numbers<[1], [0], [0], [1], [0, 0, 1, 1], [], []>} : vector<8x32xf32>, vector<32x128xf32>, vector<8x128xf32> -> vector<8x128xf32>
    %232 = arith.addf %230, %231 : vector<8x128xf32>
    %233 = vector.extract_strided_slice %232 {offsets = [0, 0], sizes = [8, 32], strides = [1, 1]} : vector<8x128xf32> to vector<8x32xf32>
    %234 = arith.negf %233 : vector<8x32xf32>
    %235 = math.exp %234 : vector<8x32xf32>
    %cst_55 = arith.constant 1.000000e+00 : f32
    %236 = vector.broadcast %cst_55 : f32 to vector<8x32xf32>
    %237 = arith.addf %236, %235 : vector<8x32xf32>
    %238 = arith.divf %236, %237 : vector<8x32xf32>
    %239 = vector.extract_strided_slice %232 {offsets = [0, 32], sizes = [8, 32], strides = [1, 1]} : vector<8x128xf32> to vector<8x32xf32>
    %240 = arith.negf %239 : vector<8x32xf32>
    %241 = math.exp %240 : vector<8x32xf32>
    %cst_56 = arith.constant 1.000000e+00 : f32
    %242 = vector.broadcast %cst_56 : f32 to vector<8x32xf32>
    %243 = arith.addf %242, %241 : vector<8x32xf32>
    %244 = arith.divf %242, %243 : vector<8x32xf32>
    %245 = vector.extract_strided_slice %232 {offsets = [0, 64], sizes = [8, 32], strides = [1, 1]} : vector<8x128xf32> to vector<8x32xf32>
    %246 = math.tanh %245 : vector<8x32xf32>
    %247 = vector.extract_strided_slice %232 {offsets = [0, 96], sizes = [8, 32], strides = [1, 1]} : vector<8x128xf32> to vector<8x32xf32>
    %248 = arith.negf %247 : vector<8x32xf32>
    %249 = math.exp %248 : vector<8x32xf32>
    %cst_57 = arith.constant 1.000000e+00 : f32
    %250 = vector.broadcast %cst_57 : f32 to vector<8x32xf32>
    %251 = arith.addf %250, %249 : vector<8x32xf32>
    %252 = arith.divf %250, %251 : vector<8x32xf32>
    %253 = arith.mulf %244, %224 : vector<8x32xf32>
    %254 = arith.mulf %238, %246 : vector<8x32xf32>
    %255 = arith.addf %253, %254 : vector<8x32xf32>
    %256 = math.tanh %255 : vector<8x32xf32>
    %257 = arith.mulf %252, %256 : vector<8x32xf32>
    %c8_i32_58 = arith.constant 8 : i32
    %c0_59 = arith.constant 0 : index
    %c0_60 = arith.constant 0 : index
    %258 = vector.load %arg4[%c0_59, %c0_60] : memref<32x128xf32, #tpu.memory_space<vmem>>, vector<32x128xf32>
    %cst_61 = arith.constant dense<0.000000e+00> : vector<8x128xf32>
    %259 = tpu.matmul %257, %258, %cst_61 {dimension_numbers = #tpu.dot_dimension_numbers<[1], [0], [0], [1], [0, 0, 1, 1], [], []>} : vector<8x32xf32>, vector<32x128xf32>, vector<8x128xf32> -> vector<8x128xf32>
    %c0_62 = arith.constant 0 : index
    %c0_63 = arith.constant 0 : index
    %260 = vector.load %arg5[%c0_62, %c0_63] : memref<1x128xf32, #tpu.memory_space<vmem>>, vector<1x128xf32>
    %261 = vector.broadcast %260 : vector<1x128xf32> to vector<8x128xf32>
    %262 = arith.addf %259, %261 : vector<8x128xf32>
    %c0_64 = arith.constant 0 : index
    %c0_65 = arith.constant 0 : index
    %263 = vector.load %arg6[%c0_64, %c0_65] : memref<8x128xf32, #tpu.memory_space<vmem>>, vector<8x128xf32>
    tpu.vector_store %arg6[%c0_64, %c0_65], %262 {strides = array<i32>} : memref<8x128xf32, #tpu.memory_space<vmem>>, vector<8x128xf32>,
    return
  }
}

</mosaic_0001>

<bundles_post_ra>
// kernel: tpu_custom_call.1
= control target key start
LH: loop header
LB: loop body
LE: loop exit
PB: predicated region body
PF: predicated region fallthrough
CT: control target
= control target key end

     0   :  { %vm65_vm0 = vcmask 1043456   ;;  %v1443_v3 = vmov 0.0|0.0   ;;  %vm40_vm1 = vcmask 31744   ;;  %s1680_s0 = inlined_call_operand.vmem [shape: f32[64,4], index: 0, kind: input, shape index: {}]   ;;  %s1681_s1 = inlined_call_operand.vmem [shape: f32[4,128], index: 1, kind: input, shape index: {}]   ;;  %s1682_s2 = inlined_call_operand.vmem [shape: f32[32,128], index: 2, kind: input, shape index: {}]   ;;  %s1683_s3 = inlined_call_operand.vmem [shape: f32[1,128], index: 3, kind: input, shape index: {}]   ;;  %s1684_s4 = inlined_call_operand.vmem [shape: f32[32,128], index: 4, kind: input, shape index: {}]   ;;  %s1685_s5 = inlined_call_operand.vmem [shape: f32[1,128], index: 5, kind: input, shape index: {}]   ;;  %s1686_s6 = inlined_call_operand.hbm [shape: f32[8,128], index: 6, kind: output, shape index: {}]  }
   0x1   :  { %v182_v0 = vld [vmem:[%s1682_s2] sm:$0xff]  ;;  %v183_v1 = vld [vmem:[%s1682_s2 + $0x8] sm:$0xff]  ;;  %1295 = vmatprep.subr.bf16.mxu1 %v1443_v3  ;;  %v184_v7 = vld [vmem:[%s1682_s2 + $0x10] sm:$0xff] }
   0x2   :  { %v32_v2 = vld [vmem:[%s1681_s1] sm:$0xf]  ;;  %v1494_v4 = vpack.c.bf16 %v183_v1, %v182_v0  ;;  %v25_v6 = vld [vmem:[%s1680_s0 + $0x8] sm:$0xff]  ;;  %v185_v8 = vld [vmem:[%s1682_s2 + $0x18] sm:$0xff] }
   0x3   :  { %1182 = vmatprep.subr.msk.mxu0 %vm65_vm0, %v32_v2  ;;  %v24_v5 = vld [vmem:[%s1680_s0] sm:$0xff] }
   0x4   :  { %1183 = vmatpush3.msk.msra.mxu0 %vm65_vm0, %v32_v2  ;;  %1184 = vmatprep.mubr.msk.f32.mxu0 %vm40_vm1, %v24_v5 }
   0x5   :  { %11 = vsyncpa [#allocation4], 0  ;;  %1297 = vmatpush3.bf16.msra.mxu1 %v1494_v4  ;;  %1185 = vmatmul.mubr.msk.f32.vlgmr.msra.gmra.mrb[0].mxu0 %vm40_vm1, %v25_v6  ;;  %v1511_v9 = vpack.c.bf16 %v185_v8, %v184_v7  ;;  %vm1444_vm2 = vmmov 0   ;;  %v1445_v10 = vmov 0.0   ;;  %v1533_v12 = vld [vmem:[%s1683_s3] ss:$0 sm:$0xff] }
   0x6   :  { %1298 = vmatprep.subr.bf16.mxu1 %v1443_v3  ;;  %1204 = vmatprep.mubr.msk.f32.mxu1 %vm1444_vm2, %v1445_v10  ;;  %s1446_s11 = smov 64   ;;  %s1447_s3 = smov 32   ;;  %vm187_vm3 = vcmask 261120   ;;  %v26_v46 = vld [vmem:[%s1680_s0 + $0x10] sm:$0xff]  ;;  %v27_v47 = vld [vmem:[%s1680_s0 + $0x18] sm:$0xff]  ;;  %v28_v48 = vld [vmem:[%s1680_s0 + $0x20] sm:$0xff] }
   0x7   :  { %1307 = vmatprep.subr.bf16.mxu0 %v1443_v3  ;;  %1187 = vmatprep.mubr.msk.f32.mxu0 %vm40_vm1, %v26_v46  ;;  %v29_v49 = vld [vmem:[%s1680_s0 + $0x28] sm:$0xff]  ;;  %v30_v50 = vld [vmem:[%s1680_s0 + $0x30] sm:$0xff]  ;;  %v31_v51 = vld [vmem:[%s1680_s0 + $0x38] sm:$0xff] }
   0x8   :  { %1309 = vmatpush3.bf16.msra.mxu0 %v1494_v4 }
   0x9   :  { %1300 = vmatpush3.bf16.msra.mxu1 %v1511_v9  ;;  %1310 = vmatprep.subr.bf16.mxu0 %v1443_v3 }
   0xa   :  { %1301 = vmatprep.subr.bf16.mxu1 %v1443_v3  ;;  %1188 = vmatmul.mubr.msk.f32.gmra.mrb[2].mxu0 %vm40_vm1, %v27_v47 }
   0xb   :  { %1190 = vmatprep.mubr.msk.f32.mxu0 %vm40_vm1, %v28_v48 }
   0xc   :  { %1205 = vmatmul.mubr.f32.vlgmr.msra.gmra.mrb[0].mxu1 %v1445_v10  ;;  %1312 = vmatpush3.bf16.msra.mxu0 %v1511_v9 }
   0xd   :  { %1303 = vmatpush3.bf16.msra.mxu1 %v1494_v4  ;;  %1215 = vmatprep.mubr.msk.f32.mxu1 %vm1444_vm2, %v1445_v10 }
   0xe   :  { %1304 = vmatprep.subr.bf16.mxu1 %v1443_v3  ;;  %1319 = vmatprep.subr.bf16.mxu0 %v1443_v3 }
   0xf   :  { %1191 = vmatmul.mubr.msk.f32.gmra.mrb[4].mxu0 %vm40_vm1, %v29_v49 }
  0x10   :  { %1193 = vmatprep.mubr.msk.f32.mxu0 %vm40_vm1, %v30_v50 }
  0x11   :  { %1306 = vmatpush3.bf16.msra.mxu1 %v1511_v9 }
  0x12   :  { %1313 = vmatprep.subr.bf16.mxu1 %v1443_v3 }
  0x13   :  { %1194 = vmatmul.mubr.msk.f32.gmra.mrb[6].mxu0 %vm40_vm1, %v31_v51 }
  0x14   :  { %1226 = vmatprep.mubr.msk.f32.mxu0 %vm1444_vm2, %v1445_v10 }
  0xd8   :  { %v1186_v11 = vpop.f32.mrb[0].mxu0 }
  0xd9   :  { %v135_v13 = vpop.f32.mrb[1].mxu0  ;;  %v141_v32 = vadd.f32 %v1186_v11, %v1533_v12 }
  0xda   :  { %v136_v14 = vadd.f32 %v1533_v12, %v135_v13 }
  0xdd   :  { %v1189_v55 = vpop.f32.mrb[2].mxu0 }
  0xde   :  { %v145_v56 = vpop.f32.mrb[3].mxu0 }
  0xdf   :  { %v257_v15 = vpop.f32.mrb[0].mxu1  ;;  %v146_v62 = vadd.f32 %v1533_v12, %v145_v56 }
  0xe0   :  { %v261_v16 = vadd.f32 %v257_v15, %v136_v14  ;;  %v1206_v17 = vpop.f32.mrb[1].mxu1 }
  0xe2   :  { %1355 = vtanh.f32 %v261_v16  ;;  %v1111_v19 = vmul.f32 -1.442695, %v261_v16  ;;  %v1578_v57 = vpop.f32.mrb[4].mxu0 }
  0xe3   :  { %v1580_v58 = vpop.f32.mrb[5].mxu0 }
  0xe4   :  { %1357 = vpow2.f32 %v1111_v19 }
  0xe6   :  { %v1582_v59 = vpop.f32.mrb[6].mxu0 }
  0xe7   :  { %v1584_v60 = vpop.f32.mrb[7].mxu0 }
  0xec   :  { %v1356_v18 = vpop.eup %1355 }
  0xed   :  { %271 = vrot.lane.b32.xlu0 %v1356_v18, %s1446_s11 }
  0xee   :  { %v1358_v20 = vpop.eup %1357 }
  0xef   :  { %v265_v21 = vadd.f32 1.0, %v1358_v20 }
  0xf1   :  { %1359 = vrcp.f32 %v265_v21  ;;  %v151_v21 = vadd.f32 %v1189_v55, %v1533_v12 }
  0xfb   :  { %v1360_v22 = vpop.eup %1359 }
  0xfc   :  { %v269_v25 = vmul.f32 0.0, %v1360_v22 }
 0x15f   :  { %v272_v23 = vpop.permute.xlu0 %271 }
 0x160   :  { %v274_v24 = vmul.f32 %v1360_v22, %v272_v23 }
 0x162   :  { %276 = vrot.lane.b32.xlu0 %v274_v24, %s1447_s3 }
 0x1d4   :  { %v277_v26 = vpop.permute.xlu0 %276 }
 0x1d5   :  { %v279_v27 = vadd.f32 %v277_v26, %v269_v25 }
 0x1d7   :  { %1361 = vtanh.f32 %v279_v27 }
 0x1e1   :  { %v1362_v28 = vpop.eup %1361 }
 0x1e2   :  { %282 = vrot.lane.b32.xlu1 %v1362_v28, %s1446_s11 }
 0x254   :  { %v283_v29 = vpop.permute.xlu1 %282 }
 0x255   :  { %v285_v30 = vmul.f32 %v1360_v22, %v283_v29 }
 0x257   :  { %289 = vrot.lane.b32.xlu1 %v285_v30, %s1447_s3 }
 0x2c9   :  { %v290_v31 = vpop.permute.xlu1 %289 }
 0x2ca   :  { %1216 = vmatmul.mubr.msk.f32.vlgmr.msra.gmra.mrb[2].mxu1 %vm187_vm3, %v290_v31 }
 0x2cb   :  { %1315 = vmatpush3.bf16.msra.mxu1 %v1494_v4  ;;  %1237 = vmatprep.mubr.msk.f32.mxu1 %vm1444_vm2, %v1445_v10 }
 0x2cc   :  { %1316 = vmatprep.subr.bf16.mxu1 %v1443_v3 }
 0x2cf   :  { %1318 = vmatpush3.bf16.msra.mxu1 %v1511_v9 }
 0x2d0   :  { %1325 = vmatprep.subr.bf16.mxu1 %v1443_v3 }
 0x39d   :  { %v359_v33 = vpop.f32.mrb[2].mxu1 }
 0x39e   :  { %v363_v34 = vadd.f32 %v359_v33, %v141_v32  ;;  %v1217_v35 = vpop.f32.mrb[3].mxu1 }
 0x3a0   :  { %1363 = vtanh.f32 %v363_v34  ;;  %v1113_v37 = vmul.f32 -1.442695, %v363_v34 }
 0x3a2   :  { %1365 = vpow2.f32 %v1113_v37 }
 0x3aa   :  { %v1364_v36 = vpop.eup %1363 }
 0x3ab   :  { %373 = vrot.lane.b32.xlu0 %v1364_v36, %s1446_s11 }
 0x3ac   :  { %v1366_v38 = vpop.eup %1365 }
 0x3ad   :  { %v367_v39 = vadd.f32 1.0, %v1366_v38 }
 0x3af   :  { %1367 = vrcp.f32 %v367_v39  ;;  %v156_v39 = vadd.f32 %v1533_v12, %v1580_v58  ;;  %v161_v58 = vadd.f32 %v1578_v57, %v1533_v12 }
 0x3b9   :  { %v1368_v40 = vpop.eup %1367 }
 0x3ba   :  { %v371_v43 = vmul.f32 %v1368_v40, %v279_v27 }
 0x41d   :  { %v374_v41 = vpop.permute.xlu0 %373 }
 0x41e   :  { %v376_v42 = vmul.f32 %v1368_v40, %v374_v41 }
 0x420   :  { %378 = vrot.lane.b32.xlu1 %v376_v42, %s1447_s3 }
 0x492   :  { %v379_v44 = vpop.permute.xlu1 %378 }
 0x493   :  { %v381_v45 = vadd.f32 %v379_v44, %v371_v43 }
 0x495   :  { %1369 = vtanh.f32 %v381_v45 }
 0x49f   :  { %v1370_v52 = vpop.eup %1369 }
 0x4a0   :  { %384 = vrot.lane.b32.xlu0 %v1370_v52, %s1446_s11 }
 0x512   :  { %v385_v53 = vpop.permute.xlu0 %384 }
 0x513   :  { %v387_v54 = vmul.f32 %v1368_v40, %v385_v53 }
 0x515   :  { %391 = vrot.lane.b32.xlu1 %v387_v54, %s1447_s3 }
 0x587   :  { %v392_v61 = vpop.permute.xlu1 %391 }
 0x588   :  { %1227 = vmatmul.mubr.msk.f32.vlgmr.msra.gmra.mrb[8].mxu0 %vm187_vm3, %v392_v61 }
 0x589   :  { %1321 = vmatpush3.bf16.msra.mxu0 %v1494_v4  ;;  %1248 = vmatprep.mubr.msk.f32.mxu0 %vm1444_vm2, %v1445_v10 }
 0x58a   :  { %1322 = vmatprep.subr.bf16.mxu0 %v1443_v3 }
 0x58d   :  { %1324 = vmatpush3.bf16.msra.mxu0 %v1511_v9 }
 0x58e   :  { %1331 = vmatprep.subr.bf16.mxu0 %v1443_v3 }
 0x65b   :  { %v461_v63 = vpop.f32.mrb[8].mxu0 }
 0x65c   :  { %v465_v0 = vadd.f32 %v461_v63, %v146_v62  ;;  %v1228_v1 = vpop.f32.mrb[9].mxu0 }
 0x65e   :  { %1371 = vtanh.f32 %v465_v0  ;;  %v1115_v5 = vmul.f32 -1.442695, %v465_v0 }
 0x660   :  { %1373 = vpow2.f32 %v1115_v5 }
 0x668   :  { %v1372_v2 = vpop.eup %1371 }
 0x669   :  { %475 = vrot.lane.b32.xlu0 %v1372_v2, %s1446_s11 }
 0x66a   :  { %v1374_v6 = vpop.eup %1373 }
 0x66b   :  { %v469_v7 = vadd.f32 1.0, %v1374_v6 }
 0x66d   :  { %1375 = vrcp.f32 %v469_v7 }
 0x677   :  { %v1376_v8 = vpop.eup %1375 }
 0x678   :  { %v473_v14 = vmul.f32 %v1376_v8, %v381_v45 }
 0x6db   :  { %v476_v11 = vpop.permute.xlu0 %475 }
 0x6dc   :  { %v478_v13 = vmul.f32 %v1376_v8, %v476_v11 }
 0x6de   :  { %480 = vrot.lane.b32.xlu1 %v478_v13, %s1447_s3 }
 0x750   :  { %v481_v15 = vpop.permute.xlu1 %480 }
 0x751   :  { %v483_v16 = vadd.f32 %v481_v15, %v473_v14 }
 0x753   :  { %1377 = vtanh.f32 %v483_v16 }
 0x75d   :  { %v1378_v17 = vpop.eup %1377 }
 0x75e   :  { %486 = vrot.lane.b32.xlu0 %v1378_v17, %s1446_s11 }
 0x7d0   :  { %v487_v18 = vpop.permute.xlu0 %486 }
 0x7d1   :  { %v489_v19 = vmul.f32 %v1376_v8, %v487_v18 }
 0x7d3   :  { %493 = vrot.lane.b32.xlu1 %v489_v19, %s1447_s3 }
 0x845   :  { %v494_v20 = vpop.permute.xlu1 %493 }
 0x846   :  { %1238 = vmatmul.mubr.msk.f32.vlgmr.msra.gmra.mrb[4].mxu1 %vm187_vm3, %v494_v20 }
 0x847   :  { %1327 = vmatpush3.bf16.msra.mxu1 %v1494_v4  ;;  %1259 = vmatprep.mubr.msk.f32.mxu1 %vm1444_vm2, %v1445_v10 }
 0x848   :  { %1328 = vmatprep.subr.bf16.mxu1 %v1443_v3 }
 0x84b   :  { %1330 = vmatpush3.bf16.msra.mxu1 %v1511_v9 }
 0x84c   :  { %1337 = vmatprep.subr.bf16.mxu1 %v1443_v3 }
 0x919   :  { %v563_v22 = vpop.f32.mrb[4].mxu1 }
 0x91a   :  { %v567_v23 = vadd.f32 %v563_v22, %v151_v21  ;;  %v1239_v24 = vpop.f32.mrb[5].mxu1 }
 0x91c   :  { %1379 = vtanh.f32 %v567_v23  ;;  %v1117_v26 = vmul.f32 -1.442695, %v567_v23 }
 0x91e   :  { %1381 = vpow2.f32 %v1117_v26 }
 0x926   :  { %v1380_v25 = vpop.eup %1379 }
 0x927   :  { %577 = vrot.lane.b32.xlu0 %v1380_v25, %s1446_s11 }
 0x928   :  { %v1382_v27 = vpop.eup %1381 }
 0x929   :  { %v571_v28 = vadd.f32 1.0, %v1382_v27 }
 0x92b   :  { %1383 = vrcp.f32 %v571_v28 }
 0x935   :  { %v1384_v29 = vpop.eup %1383 }
 0x936   :  { %v575_v32 = vmul.f32 %v1384_v29, %v483_v16  ;;  %v166_v16 = vadd.f32 %v1533_v12, %v1584_v60 }
 0x999   :  { %v578_v30 = vpop.permute.xlu0 %577 }
 0x99a   :  { %v580_v31 = vmul.f32 %v1384_v29, %v578_v30 }
 0x99c   :  { %582 = vrot.lane.b32.xlu1 %v580_v31, %s1447_s3 }
 0xa0e   :  { %v583_v33 = vpop.permute.xlu1 %582 }
 0xa0f   :  { %v585_v34 = vadd.f32 %v583_v33, %v575_v32  ;;  %v171_v32 = vadd.f32 %v1582_v59, %v1533_v12  ;;  %v1000_v59 = vld [vmem:[%s1684_s4] sm:$0xff] }
 0xa11   :  { %1385 = vtanh.f32 %v585_v34 }
 0xa1b   :  { %v1386_v35 = vpop.eup %1385 }
 0xa1c   :  { %588 = vrot.lane.b32.xlu0 %v1386_v35, %s1446_s11 }
 0xa8e   :  { %v589_v36 = vpop.permute.xlu0 %588 }
 0xa8f   :  { %v591_v37 = vmul.f32 %v1384_v29, %v589_v36 }
 0xa91   :  { %595 = vrot.lane.b32.xlu1 %v591_v37, %s1447_s3 }
 0xb03   :  { %v596_v38 = vpop.permute.xlu1 %595 }
 0xb04   :  { %1249 = vmatmul.mubr.msk.f32.vlgmr.msra.gmra.mrb[10].mxu0 %vm187_vm3, %v596_v38 }
 0xb05   :  { %1333 = vmatpush3.bf16.msra.mxu0 %v1494_v4  ;;  %1270 = vmatprep.mubr.msk.f32.mxu0 %vm1444_vm2, %v1445_v10 }
 0xb06   :  { %1334 = vmatprep.subr.bf16.mxu0 %v1443_v3 }
 0xb09   :  { %1336 = vmatpush3.bf16.msra.mxu0 %v1511_v9 }
 0xb0a   :  { %1343 = vmatprep.subr.bf16.mxu0 %v1443_v3 }
 0xbd7   :  { %v665_v40 = vpop.f32.mrb[10].mxu0 }
 0xbd8   :  { %v669_v41 = vadd.f32 %v665_v40, %v156_v39  ;;  %v1250_v42 = vpop.f32.mrb[11].mxu0 }
 0xbda   :  { %1387 = vtanh.f32 %v669_v41  ;;  %v1119_v44 = vmul.f32 -1.442695, %v669_v41 }
 0xbdc   :  { %1389 = vpow2.f32 %v1119_v44 }
 0xbe4   :  { %v1388_v43 = vpop.eup %1387 }
 0xbe5   :  { %679 = vrot.lane.b32.xlu0 %v1388_v43, %s1446_s11 }
 0xbe6   :  { %v1390_v45 = vpop.eup %1389 }
 0xbe7   :  { %v673_v46 = vadd.f32 1.0, %v1390_v45  ;;  %v1001_v45 = vld [vmem:[%s1684_s4 + $0x8] sm:$0xff] }
 0xbe9   :  { %1391 = vrcp.f32 %v673_v46  ;;  %v1002_v46 = vld [vmem:[%s1684_s4 + $0x10] sm:$0xff] }
 0xbf3   :  { %v1392_v47 = vpop.eup %1391 }
 0xbf4   :  { %v677_v50 = vmul.f32 %v1392_v47, %v585_v34 }
 0xc57   :  { %v680_v48 = vpop.permute.xlu0 %679 }
 0xc58   :  { %v682_v49 = vmul.f32 %v1392_v47, %v680_v48  ;;  %v1003_v48 = vld [vmem:[%s1684_s4 + $0x18] sm:$0xff]  ;;  %s1448_s4 = smov [#allocation3]  }
 0xc59   :  { %s1093_s1 = sshll.u32 %s1448_s4, 4  ;;  %s1094_s1 = int_to_ptr.vmem [resolvable:$true] %s1093_s1 }
 0xc5a   :  { %684 = vrot.lane.b32.xlu1 %v682_v49, %s1447_s3  ;;  %v1347_v49 = vpack.c.bf16 %v1003_v48, %v1002_v46  ;;  %s1419_s9 = scalar_lea.vmem %s1094_s1, 128  ;;  %p1424_p1 = scmp.lt.s32.totalorder %s1094_s1, %s1094_s1 }
 0xc5b   :  { %p1420_p0 = scmp.ne.s32.totalorder %s1094_s1, %s1419_s9  ;;  %p1425_p2 = scmp.lt.s32.totalorder %s1419_s9, %s1419_s9 }
 0xc5d   :  { %p1426_p3 = por %p1425_p2, %p1424_p1 }
 0xc5f   :  { %p1427_p4 = pnand %p1426_p3, %p1420_p0 }
 0xccc   :  { %v685_v51 = vpop.permute.xlu1 %684 }
 0xccd   :  { %v687_v52 = vadd.f32 %v685_v51, %v677_v50 }
 0xccf   :  { %1393 = vtanh.f32 %v687_v52 }
 0xcd9   :  { %v1394_v53 = vpop.eup %1393 }
 0xcda   :  { %690 = vrot.lane.b32.xlu0 %v1394_v53, %s1446_s11 }
 0xd4c   :  { %v691_v54 = vpop.permute.xlu0 %690 }
 0xd4d   :  { %v693_v55 = vmul.f32 %v1392_v47, %v691_v54  ;;  %v1344_v47 = vpack.c.bf16 %v1001_v45, %v1000_v59  ;;  %v1126_v54 = vld [vmem:[%s1685_s5] ss:$0 sm:$0xff] }
 0xd4f   :  { %697 = vrot.lane.b32.xlu1 %v693_v55, %s1447_s3 }
 0xdc1   :  { %v698_v56 = vpop.permute.xlu1 %697 }
 0xdc2   :  { %1260 = vmatmul.mubr.msk.f32.vlgmr.msra.gmra.mrb[6].mxu1 %vm187_vm3, %v698_v56 }
 0xdc3   :  { %1339 = vmatpush3.bf16.msra.mxu1 %v1494_v4  ;;  %1281 = vmatprep.mubr.msk.f32.mxu1 %vm1444_vm2, %v1445_v10 }
 0xdc4   :  { %1340 = vmatprep.subr.bf16.mxu1 %v1443_v3 }
 0xdc7   :  { %1342 = vmatpush3.bf16.msra.mxu1 %v1511_v9 }
 0xe95   :  { %v767_v61 = vpop.f32.mrb[6].mxu1 }
 0xe96   :  { %v771_v62 = vadd.f32 %v767_v61, %v161_v58  ;;  %v1261_v63 = vpop.f32.mrb[7].mxu1 }
 0xe98   :  { %1395 = vtanh.f32 %v771_v62  ;;  %v1121_v1 = vmul.f32 -1.442695, %v771_v62 }
 0xe9a   :  { %1397 = vpow2.f32 %v1121_v1 }
 0xea2   :  { %v1396_v0 = vpop.eup %1395 }
 0xea3   :  { %781 = vrot.lane.b32.xlu0 %v1396_v0, %s1446_s11 }
 0xea4   :  { %v1398_v4 = vpop.eup %1397 }
 0xea5   :  { %v775_v2 = vadd.f32 1.0, %v1398_v4 }
 0xea7   :  { %1399 = vrcp.f32 %v775_v2 }
 0xeb1   :  { %v1400_v5 = vpop.eup %1399 }
 0xeb2   :  { %v779_v9 = vmul.f32 %v1400_v5, %v687_v52 }
 0xf15   :  { %v782_v6 = vpop.permute.xlu0 %781 }
 0xf16   :  { %v784_v7 = vmul.f32 %v1400_v5, %v782_v6 }
 0xf18   :  { %786 = vrot.lane.b32.xlu1 %v784_v7, %s1447_s3 }
 0xf8a   :  { %v787_v8 = vpop.permute.xlu1 %786 }
 0xf8b   :  { %v789_v57 = vadd.f32 %v787_v8, %v779_v9 }
 0xf8d   :  { %1401 = vtanh.f32 %v789_v57 }
 0xf97   :  { %v1402_v11 = vpop.eup %1401 }
 0xf98   :  { %792 = vrot.lane.b32.xlu0 %v1402_v11, %s1446_s11 }
0x100a   :  { %v793_v13 = vpop.permute.xlu0 %792 }
0x100b   :  { %v795_v14 = vmul.f32 %v1400_v5, %v793_v13 }
0x100d   :  { %799 = vrot.lane.b32.xlu1 %v795_v14, %s1447_s3 }
0x107f   :  { %v800_v15 = vpop.permute.xlu1 %799 }
0x1080   :  { %1271 = vmatmul.mubr.msk.f32.vlgmr.msra.gmra.mrb[12].mxu0 %vm187_vm3, %v800_v15 }
0x1081   :  { %1292 = vmatprep.mubr.msk.f32.mxu0 %vm1444_vm2, %v1445_v10  ;;  %1345 = vmatpush3.bf16.msra.mxu0 %v1344_v47 }
0x1082   :  { %1346 = vmatprep.subr.bf16.mxu0 %v1443_v3 }
0x1085   :  { %1348 = vmatpush3.bf16.msra.mxu0 %v1347_v49 }
0x1153   :  { %v869_v17 = vpop.f32.mrb[12].mxu0 }
0x1154   :  { %v873_v18 = vadd.f32 %v869_v17, %v166_v16  ;;  %v1272_v19 = vpop.f32.mrb[13].mxu0 }
0x1156   :  { %1403 = vtanh.f32 %v873_v18  ;;  %v1123_v21 = vmul.f32 -1.442695, %v873_v18 }
0x1158   :  { %1405 = vpow2.f32 %v1123_v21 }
0x1160   :  { %v1404_v20 = vpop.eup %1403 }
0x1161   :  { %883 = vrot.lane.b32.xlu0 %v1404_v20, %s1446_s11 }
0x1162   :  { %v1406_v22 = vpop.eup %1405 }
0x1163   :  { %v877_v23 = vadd.f32 1.0, %v1406_v22 }
0x1165   :  { %1407 = vrcp.f32 %v877_v23 }
0x116f   :  { %v1408_v24 = vpop.eup %1407 }
0x1170   :  { %v881_v10 = vmul.f32 %v1408_v24, %v789_v57 }
0x11d3   :  { %v884_v25 = vpop.permute.xlu0 %883 }
0x11d4   :  { %v886_v26 = vmul.f32 %v1408_v24, %v884_v25 }
0x11d6   :  { %888 = vrot.lane.b32.xlu1 %v886_v26, %s1447_s3 }
0x1248   :  { %v889_v27 = vpop.permute.xlu1 %888 }
0x1249   :  { %v891_v60 = vadd.f32 %v889_v27, %v881_v10 }
0x124b   :  { %1409 = vtanh.f32 %v891_v60 }
0x1255   :  { %v1410_v28 = vpop.eup %1409 }
0x1256   :  { %894 = vrot.lane.b32.xlu0 %v1410_v28, %s1446_s11 }
0x12c8   :  { %v895_v29 = vpop.permute.xlu0 %894 }
0x12c9   :  { %v897_v30 = vmul.f32 %v1408_v24, %v895_v29 }
0x12cb   :  { %901 = vrot.lane.b32.xlu1 %v897_v30, %s1447_s3 }
0x133d   :  { %v902_v31 = vpop.permute.xlu1 %901 }
0x133e   :  { %1282 = vmatmul.mubr.msk.f32.vlgmr.msra.gmra.mrb[8].mxu1 %vm187_vm3, %v902_v31 }
0x1411   :  { %v971_v33 = vpop.f32.mrb[8].mxu1 }
0x1412   :  { %v975_v34 = vadd.f32 %v971_v33, %v171_v32  ;;  %v1283_v35 = vpop.f32.mrb[9].mxu1 }
0x1414   :  { %1411 = vtanh.f32 %v975_v34  ;;  %v1125_v37 = vmul.f32 -1.442695, %v975_v34 }
0x1416   :  { %1413 = vpow2.f32 %v1125_v37 }
0x141e   :  { %v1412_v36 = vpop.eup %1411 }
0x141f   :  { %985 = vrot.lane.b32.xlu0 %v1412_v36, %s1446_s11 }
0x1420   :  { %v1414_v38 = vpop.eup %1413 }
0x1421   :  { %v979_v39 = vadd.f32 1.0, %v1414_v38 }
0x1423   :  { %1415 = vrcp.f32 %v979_v39 }
0x142d   :  { %v1416_v40 = vpop.eup %1415 }
0x142e   :  { %v983_v43 = vmul.f32 %v1416_v40, %v891_v60 }
0x1491   :  { %v986_v41 = vpop.permute.xlu0 %985 }
0x1492   :  { %v988_v42 = vmul.f32 %v1416_v40, %v986_v41 }
0x1494   :  { %990 = vrot.lane.b32.xlu1 %v988_v42, %s1447_s3 }
0x1506   :  { %v991_v44 = vpop.permute.xlu1 %990 }
0x1507   :  { %v993_v12 = vadd.f32 %v991_v44, %v983_v43 }
0x1509   :  { %1417 = vtanh.f32 %v993_v12 }
0x1513   :  { %v1418_v50 = vpop.eup %1417 }
0x1514   :  { %996 = vrot.lane.b32.xlu0 %v1418_v50, %s1446_s11 }
0x1586   :  { %v997_v51 = vpop.permute.xlu0 %996 }
0x1587   :  { %v999_v52 = vmul.f32 %v1416_v40, %v997_v51 }
0x1589   :  { %1012 = vrot.lane.b32.xlu1 %v999_v52, %s1447_s3 }
0x15fb   :  { %v1013_v53 = vpop.permute.xlu1 %1012 }
0x15fc   :  { %1293 = vmatmul.mubr.msk.f32.vlgmr.msra.gmra.mrb[14].mxu0 %vm187_vm3, %v1013_v53 }
0x16cf   :  { %v1082_v55 = vpop.f32.mrb[14].mxu0 }
0x16d0   :  { %v1083_v56 = vadd.f32 %v1126_v54, %v1082_v55  ;;  %v1294_v3 = vpop.f32.mrb[15].mxu0 }
0x16d2   :  { %1086 = vst [vmem:[#allocation3] sm:$0xff] %v1083_v56 }
0x16d3   :  { %1430 = shalt.err (!%p1427_p4)
}
0x16d4   :  { %s1431_s11 = scalar_lea.hbm %s1686_s6, 128 }
0x16d5   :  { %p1432_p5 = scmp.ne.s32.totalorder %s1686_s6, %s1431_s11  ;;  %p1435_p6 = scmp.lt.u32.totalorder %s1431_s11, %s1686_s6 }
0x16d7   :  { %p1437_p7 = pnand %p1435_p6, %p1432_p5 }
0x16d9   :  { %1440 = shalt.err (!%p1437_p7)
}
0x16da   :  { %1096 = dma.vmem_to_hbm [thread:$0]  %s1094_s1, 128, %s1686_s6, [#allocation4]  }
0x16db   :  { %1441 = dma.done.wait [#allocation4], 128  }
0x16dc   :  { %1442 = vsyncadd [#allocation4], 4294967168 }
0x16dd   :  { %1100 = vsyncpa [#allocation4], 1 }

</bundles_post_ra>
